<compile_context>
chip_gen: v6e
topology: v6e:2x2x1
jax: 0.10.0
libtpu: 0.0.40
codegen_flags: <defaults>
</compile_context>

<pallas_src>
import math

import numpy as np
import jax
import jax.numpy as jnp
from jax.experimental import pallas as pl
from jax.experimental.pallas import tpu as pltpu


def _round_up(x: int, n: int) -> int:
    return ((x + n - 1) // n) * n


def make_arc_kernel(s: float, m: float):
    cos_m = math.cos(m)
    sin_m = math.sin(m)
    th = math.cos(math.pi - m)
    mm = math.sin(math.pi - m) * m

    def arc_kernel(x_ref, wt_ref, inv_ref, labels_ref, o_ref):
        # One (TM, TN) output tile of the ArcFace head.
        tn = o_ref.shape[1]
        col0 = pl.program_id(1) * tn              # global class offset of tile

        # Cosine logits: MXU matmul in operand dtype (bf16 by default) with
        # f32 accumulation, then scale by the precomputed per-class 1/||w||.
        logits = jnp.dot(x_ref[...], wt_ref[...],
                         preferred_element_type=jnp.float32)       # [TM, TN]
        cos_th = jnp.clip(logits * inv_ref[...], -1.0, 1.0)

        # Margin math in f32 on the VPU (guard sqrt against tiny negatives).
        sin_th = jnp.sqrt(jnp.maximum(1.0 - cos_th * cos_th, 0.0))
        cos_th_m = cos_th * cos_m - sin_th * sin_m
        cos_th_m = jnp.where(cos_th - th > 0.0, cos_th_m, cos_th - mm)

        # One-hot select: shift labels into tile-local coordinates ([TM,1] op)
        # and compare against the local column iota (replaces scatter_ and the
        # float one-hot blend with a single vsel).
        col = jax.lax.broadcasted_iota(jnp.int32, cos_th.shape, 1)
        target = labels_ref[...] - col0                            # [TM, 1]
        out = jnp.where(col == target, cos_th_m, cos_th)
        o_ref[...] = (out * s).astype(o_ref.dtype)

    return arc_kernel


def arc_module_forward(inputs, weight, labels, *, s=15.0, m=0.5,
                       tile_n=512, matmul_dtype=jnp.bfloat16,
                       out_dtype=jnp.float32,
                       vmem_budget_bytes=40 * 1024 * 1024):
    """ArcFace margin head forward.

    inputs : [B, D] float   activations
    weight : [C, D] float   (PyTorch nn.Linear layout)
    labels : [B]    int
    returns [B, C] out_dtype == ArcModule(inputs, labels)
    """
    B, D = inputs.shape
    C, Dw = weight.shape
    assert D == Dw

    # ---- hoisted out of the kernel (done once, not per class tile) --------
    # per-class 1 / max(||w_c||, eps)  (== F.normalize(weight, dim=1) scale)
    w_f32 = weight.astype(jnp.float32)
    inv_norm = (1.0 / jnp.maximum(jnp.sqrt(jnp.sum(w_f32 * w_f32, axis=1)),
                                  1e-12)).reshape(1, C)              # [1, C]

    # bf16 cast BEFORE the transpose -> the relayout pass writes half the
    # bytes; no class-axis padding (Pallas masks ragged trailing blocks).
    wt = weight.astype(matmul_dtype).T                               # [D, C]
    x = inputs.astype(matmul_dtype)                                  # [B, D]
    lab = labels.astype(jnp.int32).reshape(B, 1)                     # [B, 1]

    # ---- tile sizes ---------------------------------------------------------
    # class tile: lane-dense multiple of 128 when streaming, else the full C.
    if C > tile_n:
        assert tile_n % 128 == 0, "tile_n must be a multiple of 128"
        tn = tile_n
    else:
        tn = C

    # batch tile: whole batch if it fits the VMEM budget (-> weight streamed
    # from HBM exactly once), else a 16-aligned cap (bf16 packs 2 rows/sublane).
    in_bytes = np.dtype(matmul_dtype).itemsize
    out_bytes = np.dtype(out_dtype).itemsize
    per_row = 2 * D * in_bytes + 2 * tn * out_bytes + 8      # x + out (2 bufs)
    fixed = 2 * D * tn * in_bytes + 4 * tn * 4 + (1 << 16)   # wt + inv + slack
    cap = max(16, ((vmem_budget_bytes - fixed) // per_row) // 16 * 16)
    tm = B if B <= cap else cap

    nb = pl.cdiv(B, tm)
    nc = pl.cdiv(C, tn)

    kernel = make_arc_kernel(float(s), float(m))

    out = pl.pallas_call(
        kernel,
        out_shape=jax.ShapeDtypeStruct((B, C), out_dtype),
        grid=(nb, nc),
        in_specs=[
            pl.BlockSpec((tm, D), lambda i, j: (i, 0)),    # activations (resident over j)
            pl.BlockSpec((D, tn), lambda i, j: (0, j)),    # weight (streamed once if nb==1)
            pl.BlockSpec((1, tn), lambda i, j: (0, j)),    # 1/||w|| per class
            pl.BlockSpec((tm, 1), lambda i, j: (i, 0)),    # labels
        ],
        out_specs=pl.BlockSpec((tm, tn), lambda i, j: (i, j)),
        compiler_params=pltpu.CompilerParams(
            # class axis parallel -> megacore sharding even when nb == 1.
            dimension_semantics=("parallel", "parallel"),
            vmem_limit_bytes=int(min(vmem_budget_bytes + (16 << 20), 100 << 20)),
        ),
    )(x, wt, inv_norm, lab)

    return out


def reference_arc(inputs, weight, labels, *, s=15.0, m=0.5,
                  matmul_dtype=jnp.float32):
    """Pure-JAX reference matching the PyTorch forward (same numeric path as
    the kernel when matmul_dtype matches)."""
    cos_m, sin_m = math.cos(m), math.sin(m)
    th = math.cos(math.pi - m)
    mm = math.sin(math.pi - m) * m

    inputs = inputs.astype(jnp.float32)
    weight = weight.astype(jnp.float32)
    inv = 1.0 / jnp.maximum(jnp.linalg.norm(weight, axis=1), 1e-12)   # [C]
    logits = jax.lax.dot_general(
        inputs.astype(matmul_dtype), weight.astype(matmul_dtype),
        dimension_numbers=(((1,), (1,)), ((), ())),
        preferred_element_type=jnp.float32)                            # [B, C]
    cos_th = jnp.clip(logits * inv[None, :], -1.0, 1.0)
    sin_th = jnp.sqrt(jnp.maximum(1.0 - cos_th * cos_th, 0.0))
    cos_th_m = cos_th * cos_m - sin_th * sin_m
    cos_th_m = jnp.where(cos_th - th > 0.0, cos_th_m, cos_th - mm)
    onehot = jax.nn.one_hot(labels, weight.shape[0], dtype=jnp.float32)
    return jnp.where(onehot > 0, cos_th_m, cos_th) * s


if __name__ == "__main__":
    root = jax.random.PRNGKey(0)

    # --- Test 1: small shapes consistent with the module (single tile) -----
    B, D, C = 8, 32, 16
    k_x, k_w, k_l = jax.random.split(jax.random.fold_in(root, 0), 3)
    x = jax.random.normal(k_x, (B, D), dtype=jnp.float32)
    xavier_std = math.sqrt(2.0 / (D + C))          # xavier_normal_ on [C, D]
    w = xavier_std * jax.random.normal(k_w, (C, D), dtype=jnp.float32)
    lab = jax.random.randint(k_l, (B,), 0, C, dtype=jnp.int32)

    out = jax.block_until_ready(arc_module_forward(x, w, lab, s=15.0, m=0.5))
    ref = reference_arc(x, w, lab, s=15.0, m=0.5, matmul_dtype=jnp.bfloat16)
    assert out.shape == (B, C)
    assert jnp.allclose(out, ref, atol=2e-3, rtol=2e-3), "mismatch (test 1)"

    # --- Test 2: ragged class axis, multiple class tiles, nb == 1 ----------
    B2, D2, C2 = 130, 64, 300
    k_x2, k_w2, k_l2 = jax.random.split(jax.random.fold_in(root, 1), 3)
    x2 = jax.random.normal(k_x2, (B2, D2), dtype=jnp.float32)
    w2 = math.sqrt(2.0 / (D2 + C2)) * jax.random.normal(
        k_w2, (C2, D2), dtype=jnp.float32)
    lab2 = jax.random.randint(k_l2, (B2,), 0, C2, dtype=jnp.int32)

    out2 = jax.block_until_ready(
        arc_module_forward(x2, w2, lab2, s=15.0, m=0.5, tile_n=128))
    ref2 = reference_arc(x2, w2, lab2, s=15.0, m=0.5,
                         matmul_dtype=jnp.bfloat16)
    assert out2.shape == (B2, C2)
    assert jnp.allclose(out2, ref2, atol=2e-3, rtol=2e-3), "mismatch (test 2)"

    # --- Test 3: force a tiny VMEM budget -> nb > 1, ragged batch tile -----
    out3 = jax.block_until_ready(
        arc_module_forward(x2, w2, lab2, s=15.0, m=0.5, tile_n=128,
                           vmem_budget_bytes=200_000))
    assert out3.shape == (B2, C2)
    assert jnp.allclose(out3, ref2, atol=2e-3, rtol=2e-3), "mismatch (test 3)"

    print("KERNEL_OK")
</pallas_src>

<mosaic_0001>
module attributes {stable_mosaic.version = 11 : i64} {
  func.func @arc_kernel(%arg0: i32, %arg1: i32, %arg2: memref<8x32xbf16, #tpu.memory_space<vmem>>, %arg3: memref<32x16xbf16, #tpu.memory_space<vmem>>, %arg4: memref<1x16xf32, #tpu.memory_space<vmem>>, %arg5: memref<8x1xi32, #tpu.memory_space<vmem>>, %arg6: memref<8x16xf32, #tpu.memory_space<vmem>>) attributes {dimension_semantics = [#tpu.dimension_semantics<parallel>, #tpu.dimension_semantics<parallel>], iteration_bounds = array<i64: 1, 1>, scalar_prefetch = 0 : i64, scratch_operands = 0 : i64, tpu.core_type = #tpu.core_type<tc>, window_params = [{transform_indices = @transform_0, window_bounds = array<i64: 8, 32>}, {transform_indices = @transform_1, window_bounds = array<i64: 32, 16>}, {transform_indices = @transform_2, window_bounds = array<i64: 1, 16>}, {transform_indices = @transform_3, window_bounds = array<i64: 8, 1>}, {transform_indices = @transform_4, window_bounds = array<i64: 8, 16>}]} {
    %c16_i32 = arith.constant 16 : i32
    %0 = arith.muli %arg1, %c16_i32 : i32
    %c0 = arith.constant 0 : index
    %c0_0 = arith.constant 0 : index
    %1 = vector.load %arg2[%c0, %c0_0] : memref<8x32xbf16, #tpu.memory_space<vmem>>, vector<8x32xbf16>
    %c0_1 = arith.constant 0 : index
    %c0_2 = arith.constant 0 : index
    %2 = vector.load %arg3[%c0_1, %c0_2] : memref<32x16xbf16, #tpu.memory_space<vmem>>, vector<32x16xbf16>
    %cst = arith.constant dense<0.000000e+00> : vector<8x16xf32>
    %3 = tpu.matmul %1, %2, %cst {dimension_numbers = #tpu.dot_dimension_numbers<[1], [0], [0], [1], [0, 0, 1, 1], [], []>} : vector<8x32xbf16>, vector<32x16xbf16>, vector<8x16xf32> -> vector<8x16xf32>
    %c0_3 = arith.constant 0 : index
    %c0_4 = arith.constant 0 : index
    %4 = vector.load %arg4[%c0_3, %c0_4] : memref<1x16xf32, #tpu.memory_space<vmem>>, vector<1x16xf32>
    %5 = vector.broadcast %4 : vector<1x16xf32> to vector<8x16xf32>
    %6 = arith.mulf %3, %5 : vector<8x16xf32>
    %cst_5 = arith.constant -1.000000e+00 : f32
    %cst_6 = arith.constant 1.000000e+00 : f32
    %7 = vector.broadcast %cst_5 : f32 to vector<8x16xf32>
    %8 = arith.maximumf %7, %6 : vector<8x16xf32>
    %9 = vector.broadcast %cst_6 : f32 to vector<8x16xf32>
    %10 = arith.minimumf %9, %8 : vector<8x16xf32>
    %11 = arith.mulf %10, %10 : vector<8x16xf32>
    %cst_7 = arith.constant 1.000000e+00 : f32
    %12 = vector.broadcast %cst_7 : f32 to vector<8x16xf32>
    %13 = arith.subf %12, %11 : vector<8x16xf32>
    %cst_8 = arith.constant 0.000000e+00 : f32
    %14 = vector.broadcast %cst_8 : f32 to vector<8x16xf32>
    %15 = arith.maximumf %13, %14 : vector<8x16xf32>
    %16 = math.sqrt %15 : vector<8x16xf32>
    %cst_9 = arith.constant 0.87758255 : f32
    %17 = vector.broadcast %cst_9 : f32 to vector<8x16xf32>
    %18 = arith.mulf %10, %17 : vector<8x16xf32>
    %cst_10 = arith.constant 0.47942555 : f32
    %19 = vector.broadcast %cst_10 : f32 to vector<8x16xf32>
    %20 = arith.mulf %16, %19 : vector<8x16xf32>
    %21 = arith.subf %18, %20 : vector<8x16xf32>
    %cst_11 = arith.constant -0.87758255 : f32
    %22 = vector.broadcast %cst_11 : f32 to vector<8x16xf32>
    %23 = arith.subf %10, %22 : vector<8x16xf32>
    %cst_12 = arith.constant 0.000000e+00 : f32
    %24 = vector.broadcast %cst_12 : f32 to vector<8x16xf32>
    %25 = arith.cmpf ogt, %23, %24 : vector<8x16xf32>
    %cst_13 = arith.constant 0.239712775 : f32
    %26 = vector.broadcast %cst_13 : f32 to vector<8x16xf32>
    %27 = arith.subf %10, %26 : vector<8x16xf32>
    %28 = arith.select %25, %21, %27 : vector<8x16xi1>, vector<8x16xf32>
    %29 = tpu.iota {dimensions = array<i32: 1>} : vector<8x16xi32>
    %c0_14 = arith.constant 0 : index
    %c0_15 = arith.constant 0 : index
    %30 = vector.load %arg5[%c0_14, %c0_15] : memref<8x1xi32, #tpu.memory_space<vmem>>, vector<8x1xi32>
    %31 = vector.broadcast %0 : i32 to vector<8x1xi32>
    %32 = arith.subi %30, %31 : vector<8x1xi32>
    %33 = vector.broadcast %32 : vector<8x1xi32> to vector<8x16xi32>
    %34 = arith.cmpi eq, %29, %33 : vector<8x16xi32>
    %35 = arith.select %34, %28, %10 : vector<8x16xi1>, vector<8x16xf32>
    %cst_16 = arith.constant 1.500000e+01 : f32
    %36 = vector.broadcast %cst_16 : f32 to vector<8x16xf32>
    %37 = arith.mulf %35, %36 : vector<8x16xf32>
    %c0_17 = arith.constant 0 : index
    %c0_18 = arith.constant 0 : index
    %38 = vector.load %arg6[%c0_17, %c0_18] : memref<8x16xf32, #tpu.memory_space<vmem>>, vector<8x16xf32>
    tpu.vector_store %arg6[%c0_17, %c0_18], %37 {strides = array<i32>} : memref<8x16xf32, #tpu.memory_space<vmem>>, vector<8x16xf32>,
    return
  }
  func.func @transform_0(%arg0: i32, %arg1: i32) -> (i32, i32) {
    %c0_i32 = arith.constant 0 : i32
    %c0_i32_0 = arith.constant 0 : i32
    return %arg0, %c0_i32 : i32, i32
  }
  func.func @transform_1(%arg0: i32, %arg1: i32) -> (i32, i32) {
    %c0_i32 = arith.constant 0 : i32
    %c0_i32_0 = arith.constant 0 : i32
    return %c0_i32, %arg1 : i32, i32
  }
  func.func @transform_2(%arg0: i32, %arg1: i32) -> (i32, i32) {
    %c0_i32 = arith.constant 0 : i32
    %c0_i32_0 = arith.constant 0 : i32
    return %c0_i32, %arg1 : i32, i32
  }
  func.func @transform_3(%arg0: i32, %arg1: i32) -> (i32, i32) {
    %c0_i32 = arith.constant 0 : i32
    %c0_i32_0 = arith.constant 0 : i32
    return %arg0, %c0_i32 : i32, i32
  }
  func.func @transform_4(%arg0: i32, %arg1: i32) -> (i32, i32) {
    %c0_i32 = arith.constant 0 : i32
    return %arg0, %arg1 : i32, i32
  }
}

</mosaic_0001>

<bundles_post_ra>
// kernel: tpu_custom_call.1
= control target key start
LH: loop header
LB: loop body
LE: loop exit
PB: predicated region body
PF: predicated region fallthrough
CT: control target
= control target key end

     0   :  { %v184_v1 = vmov 0.0   ;;  %vm185_vm0 = vmmov 0   ;;  %v186_v4 = vmov 0   ;;  %s231_s0 = inlined_call_operand.vmem [shape: bf16[8,32], index: 0, kind: input, shape index: {}]   ;;  %s232_s1 = inlined_call_operand.vmem [shape: bf16[32,16], index: 1, kind: input, shape index: {}]   ;;  %s233_s2 = inlined_call_operand.vmem [shape: f32[1,16], index: 2, kind: input, shape index: {}]   ;;  %s234_s3 = inlined_call_operand.vmem [shape: s32[8,1], index: 3, kind: input, shape index: {}]   ;;  %s235_s4 = inlined_call_operand.hbm [shape: f32[8,16], index: 4, kind: output, shape index: {}]  }
   0x1   :  { %v158_v0 = vld [vmem:[%s232_s1 + $0x8] sm:$0xff]   ;;  %145 = vmatprep.subr.bf16.mxu0 %v184_v1  ;;  %v159_v2 = vld [vmem:[%s232_s1] sm:$0xff]   ;;  %149 = vmatprep.mubr.msk.bf16.mxu0 %vm185_vm0, %v184_v1 }
   0x2   :  { %146 = vmatpush3.bf16.msra.mxu0 %v158_v0  ;;  %v110_v3 = vld [vmem:[%s234_s3] sm:$0xff]  ;;  %157 = vset.pattern.permute.xlu0 %v186_v4 }
   0x3   :  { %147 = vmatprep.subr.bf16.mxu0 %v184_v1 }
   0x4   :  { %9 = vsyncpa [#allocation3], 0  ;;  %114 = vperm.xlu0 %157, %v110_v3   ;;  %v20_v5 = vld [vmem:[%s231_s0] sm:$0xf]  ;;  %vm37_vm1 = vcmask 261120   ;;  %v108_v16 = vlaneseq  ;;  %s187_s0 = smov [#allocation2]  }
   0x5   :  { %v138_v6 = vld [vmem:[%s233_s2] ss:$0 sm:$0xff]  ;;  %s127_s2 = sshll.u32 %s187_s0, 4  ;;  %vm119_vm6 = vcmask 130048   ;;  %s128_s2 = int_to_ptr.vmem [resolvable:$true] %s127_s2 }
   0x6   :  { %148 = vmatpush3.bf16.msra.mxu0 %v159_v2  ;;  %v109_v21 = vand.u32 127, %v108_v16  ;;  %s162_s3 = scalar_lea.vmem %s128_s2, 128  ;;  %p167_p1 = scmp.lt.s32.totalorder %s128_s2, %s128_s2 }
   0x7   :  { %p163_p0 = scmp.ne.s32.totalorder %s128_s2, %s162_s3  ;;  %p168_p2 = scmp.lt.s32.totalorder %s162_s3, %s162_s3 }
   0x9   :  { %150 = vmatmul.mubr.msk.bf16.vlgmr.msra.gmra.mxu0 %vm37_vm1, %v20_v5  ;;  %p169_p3 = por %p168_p2, %p167_p1 }
   0xb   :  { %p170_p4 = pnand %p169_p3, %p163_p0 }
  0x7f   :  { %v115_v22 = vpop.permute.xlu0 %114 }
  0x80   :  { %vm116_vm4 = vcmp.eq.s32.totalorder %v109_v21, %v115_v22 }
  0xc9   :  { %v75_v7 = vpop.f32.mrf.mxu0 }
  0xca   :  { %v88_v8 = vmul.f32 %v138_v6, %v75_v7 }
  0xcb   :  { %v151_v9 = vpop.f32.mrf.mxu0 }
  0xcc   :  { %v139_v10 = vclamps-f32 %v88_v8, 1.0 }
  0xcd   :  { %v78_v11 = vpop.f32.mrf.mxu0 }
  0xce   :  { %v91_v12 = vmul.f32 %v139_v10, %v139_v10  ;;  %v140_v24 = vadd.f32 0.87758255, %v139_v10  ;;  %v101_v25 = vmul.f32 0.87758255, %v139_v10  ;;  %v141_v28 = vadd.f32 -0.23971277, %v139_v10 }
  0xcf   :  { %v152_v13 = vpop.f32.mrf.mxu0 }
  0xd0   :  { %v92_v14 = vsub.f32 1.0, %v91_v12  ;;  %vm105_vm5 = vcmp.gt.f32.partialorder %v140_v24, 0.0 }
  0xd2   :  { %v93_v15 = vmax.f32 %v92_v14, 0.0 }
  0xd4   :  { %160 = vrsqrt.f32 %v93_v15  ;;  %vm96_vm2 = vcmp.eq.f32.partialorder %v93_v15, inf  ;;  %v99_v19 = vand.u32 2147483648, %v93_v15  ;;  %vm98_vm3 = vcmp.eq.f32.partialorder %v93_v15, 0.0 }
  0xe1   :  { %v161_v17 = vpop.eup %160 }
  0xe2   :  { %v95_v18 = vmul.f32 %v161_v17, %v93_v15 }
  0xe4   :  { %v97_v20 = vsel %vm96_vm2, %v93_v15, %v95_v18 }
  0xe5   :  { %v100_v23 = vsel %vm98_vm3, %v99_v19, %v97_v20 }
  0xe6   :  { %v102_v26 = vmul.f32 0.47942555, %v100_v23 }
  0xe8   :  { %v103_v27 = vsub.f32 %v101_v25, %v102_v26 }
  0xea   :  { %v107_v29 = vsel %vm105_vm5, %v103_v27, %v141_v28 }
  0xeb   :  { %v117_v30 = vsel %vm116_vm4, %v107_v29, %v139_v10 }
  0xec   :  { %v118_v31 = vmul.f32 15.0, %v117_v30 }
  0xee   :  { %120 = vst.msk [vmem:[#allocation2] sm:$0xff] %vm119_vm6, %v118_v31 }
  0xef   :  { %173 = shalt.err (!%p170_p4)
}
  0xf0   :  { %130 = dma.vmem_to_hbm [thread:$0]  %s128_s2, 128, %s235_s4, [#allocation3]  }
  0xf1   :  { %182 = dma.done.wait [#allocation3], 128  }
  0xf2   :  { %183 = vsyncadd [#allocation3], 4294967168 }
  0xf3   :  { %134 = vsyncpa [#allocation3], 1 }

</bundles_post_ra>
